<compile_context>
chip_gen: v5e
topology: v5e:2x2
jax: 0.10.0
libtpu: 0.0.40
codegen_flags: <defaults>
</compile_context>

<pallas_src>
import functools

import jax
import jax.numpy as jnp
from jax.experimental import pallas as pl
from jax.experimental.pallas import tpu as pltpu


def _round_up(x, m):
    return ((x + m - 1) // m) * m


# --------------------------------------------------------------------------
# Pallas kernel: one (Bt, 2) batch tile  ->  ReLU(x @ W^T + b)  of shape (Bt, D)
# --------------------------------------------------------------------------
def age_sex_kernel(x_ref, wt_ref, b_ref, o_ref):
    x = x_ref[...].astype(jnp.float32)        # (Bt, F)   F == 2
    wt = wt_ref[...].astype(jnp.float32)      # (F, D)
    b = b_ref[...].astype(jnp.float32)        # (1, D)

    n_feat = x.shape[1]
    # VPU outer-product accumulation (F is tiny, fully unrolled at trace time).
    out = x[:, 0:1] * wt[0:1, :] + b          # (Bt, D) via lane/sublane bcast
    for k in range(1, n_feat):
        out = out + x[:, k:k + 1] * wt[k:k + 1, :]

    o_ref[...] = jnp.maximum(out, 0.0).astype(o_ref.dtype)


# --------------------------------------------------------------------------
# Wrapper
# --------------------------------------------------------------------------
def age_sex_encoding(age_sex, weight, bias, *, block_b=None):
    """ReLU(age_sex @ weight.T + bias) — PyTorch Linear semantics.

    age_sex: (B, 2)   weight: (D, 2)   bias: (D,)   ->   (B, D)
    """
    B, F = age_sex.shape
    D = weight.shape[0]
    assert weight.shape == (D, F)
    assert bias.shape == (D,)

    # Host-side parameter prep: lane-dense weight/bias layouts.
    wt = weight.T.astype(jnp.float32)                 # (F, D)
    b2 = bias.reshape(1, D).astype(jnp.float32)       # (1, D)

    # Batch tile: multiple rows per grid step, sublane-aligned.
    if block_b is None:
        block_b = min(512, _round_up(B, 8))
    b_pad = _round_up(B, block_b)
    x = age_sex
    if b_pad != B:
        x = jnp.pad(x, ((0, b_pad - B), (0, 0)))

    grid = (b_pad // block_b,)

    out = pl.pallas_call(
        age_sex_kernel,
        out_shape=jax.ShapeDtypeStruct((b_pad, D), age_sex.dtype),
        grid_spec=pltpu.PrefetchScalarGridSpec(
            num_scalar_prefetch=0,
            grid=grid,
            in_specs=[
                pl.BlockSpec((block_b, F), lambda i: (i, 0)),   # batch tile
                pl.BlockSpec((F, D), lambda i: (0, 0)),         # W^T (full)
                pl.BlockSpec((1, D), lambda i: (0, 0)),         # bias (full)
            ],
            out_specs=pl.BlockSpec((block_b, D), lambda i: (i, 0)),
        ),
        compiler_params=pltpu.CompilerParams(
            dimension_semantics=("parallel",)),
    )(x, wt, b2)

    return out[:B]


# --------------------------------------------------------------------------
# Pure-JAX reference (same semantics as the PyTorch module, eval == train here)
# --------------------------------------------------------------------------
def age_sex_encoding_ref(age_sex, weight, bias):
    return jax.nn.relu(age_sex @ weight.T + bias[None, :])


if __name__ == "__main__":
    output_dim = 128
    B = 2

    key = jax.random.PRNGKey(0)
    k_w, k_b, k_x = jax.random.split(key, 3)

    # PyTorch-style Linear params: weight (output_dim, 2), bias (output_dim,)
    weight = (jax.random.normal(k_w, (output_dim, 2)) * 0.1).astype(jnp.float32)
    bias = (jax.random.normal(k_b, (output_dim,)) * 0.1).astype(jnp.float32)

    # age_sex input: (B, 2)  (e.g. normalized age and sex flag)
    age_sex = jax.random.normal(k_x, (B, 2), dtype=jnp.float32)

    out = age_sex_encoding(age_sex, weight, bias)
    out = jax.block_until_ready(out)

    ref = age_sex_encoding_ref(age_sex, weight, bias)
    assert out.shape == ref.shape, (out.shape, ref.shape)
    assert jnp.allclose(out, ref, atol=1e-5, rtol=1e-5), \
        f"max abs err {jnp.max(jnp.abs(out - ref))}"

    print("KERNEL_OK")
</pallas_src>

<mosaic_0001>
module attributes {stable_mosaic.version = 11 : i64} {
  func.func @age_sex_kernel(%arg0: i32, %arg1: memref<8x2xf32, #tpu.memory_space<vmem>>, %arg2: memref<2x128xf32, #tpu.memory_space<vmem>>, %arg3: memref<1x128xf32, #tpu.memory_space<vmem>>, %arg4: memref<8x128xf32, #tpu.memory_space<vmem>>) attributes {dimension_semantics = [#tpu.dimension_semantics<parallel>], iteration_bounds = array<i64: 1>, scalar_prefetch = 0 : i64, scratch_operands = 0 : i64, tpu.core_type = #tpu.core_type<tc>, window_params = [{transform_indices = @transform_0, window_bounds = array<i64: 8, 2>}, {pipeline_mode = #tpu.pipeline_mode<synchronous>, transform_indices = @transform_1, window_bounds = array<i64: 2, 128>}, {pipeline_mode = #tpu.pipeline_mode<synchronous>, transform_indices = @transform_2, window_bounds = array<i64: 1, 128>}, {transform_indices = @transform_3, window_bounds = array<i64: 8, 128>}]} {
    %c0 = arith.constant 0 : index
    %c0_0 = arith.constant 0 : index
    %0 = vector.load %arg1[%c0, %c0_0] : memref<8x2xf32, #tpu.memory_space<vmem>>, vector<8x2xf32>
    %c0_1 = arith.constant 0 : index
    %c0_2 = arith.constant 0 : index
    %1 = vector.load %arg2[%c0_1, %c0_2] : memref<2x128xf32, #tpu.memory_space<vmem>>, vector<2x128xf32>
    %c0_3 = arith.constant 0 : index
    %c0_4 = arith.constant 0 : index
    %2 = vector.load %arg3[%c0_3, %c0_4] : memref<1x128xf32, #tpu.memory_space<vmem>>, vector<1x128xf32>
    %3 = vector.extract_strided_slice %0 {offsets = [0, 0], sizes = [8, 1], strides = [1, 1]} : vector<8x2xf32> to vector<8x1xf32>
    %4 = vector.extract_strided_slice %1 {offsets = [0, 0], sizes = [1, 128], strides = [1, 1]} : vector<2x128xf32> to vector<1x128xf32>
    %5 = vector.broadcast %3 : vector<8x1xf32> to vector<8x128xf32>
    %6 = vector.broadcast %4 : vector<1x128xf32> to vector<8x128xf32>
    %7 = arith.mulf %5, %6 : vector<8x128xf32>
    %8 = vector.broadcast %2 : vector<1x128xf32> to vector<8x128xf32>
    %9 = arith.addf %7, %8 : vector<8x128xf32>
    %10 = vector.extract_strided_slice %0 {offsets = [0, 1], sizes = [8, 1], strides = [1, 1]} : vector<8x2xf32> to vector<8x1xf32>
    %11 = vector.extract_strided_slice %1 {offsets = [1, 0], sizes = [1, 128], strides = [1, 1]} : vector<2x128xf32> to vector<1x128xf32>
    %12 = vector.broadcast %10 : vector<8x1xf32> to vector<8x128xf32>
    %13 = vector.broadcast %11 : vector<1x128xf32> to vector<8x128xf32>
    %14 = arith.mulf %12, %13 : vector<8x128xf32>
    %15 = arith.addf %9, %14 : vector<8x128xf32>
    %cst = arith.constant 0.000000e+00 : f32
    %16 = vector.broadcast %cst : f32 to vector<8x128xf32>
    %17 = arith.maximumf %15, %16 : vector<8x128xf32>
    %c0_5 = arith.constant 0 : index
    %c0_6 = arith.constant 0 : index
    %18 = vector.load %arg4[%c0_5, %c0_6] : memref<8x128xf32, #tpu.memory_space<vmem>>, vector<8x128xf32>
    tpu.vector_store %arg4[%c0_5, %c0_6], %17 {strides = array<i32>} : memref<8x128xf32, #tpu.memory_space<vmem>>, vector<8x128xf32>,
    return
  }
  func.func @transform_0(%arg0: i32) -> (i32, i32) {
    %c0_i32 = arith.constant 0 : i32
    %c0_i32_0 = arith.constant 0 : i32
    return %arg0, %c0_i32 : i32, i32
  }
  func.func @transform_1(%arg0: i32) -> (i32, i32) {
    %c0_i32 = arith.constant 0 : i32
    %c0_i32_0 = arith.constant 0 : i32
    %c0_i32_1 = arith.constant 0 : i32
    return %c0_i32, %c0_i32_0 : i32, i32
  }
  func.func @transform_2(%arg0: i32) -> (i32, i32) {
    %c0_i32 = arith.constant 0 : i32
    %c0_i32_0 = arith.constant 0 : i32
    %c0_i32_1 = arith.constant 0 : i32
    return %c0_i32, %c0_i32_0 : i32, i32
  }
  func.func @transform_3(%arg0: i32) -> (i32, i32) {
    %c0_i32 = arith.constant 0 : i32
    %c0_i32_0 = arith.constant 0 : i32
    return %arg0, %c0_i32 : i32, i32
  }
}

</mosaic_0001>

<bundles_post_ra>
// kernel: tpu_custom_call.1
= control target key start
LH: loop header
LB: loop body
LE: loop exit
PB: predicated region body
PF: predicated region fallthrough
CT: control target
= control target key end

     0   :  { %v86_v1 = vmov 0   ;;  %s121_s0 = inlined_call_operand.vmem [shape: f32[8,2], index: 0, kind: input, shape index: {}]   ;;  %s122_s1 = inlined_call_operand.vmem [shape: f32[2,128], index: 1, kind: input, shape index: {}]   ;;  %s123_s2 = inlined_call_operand.vmem [shape: f32[1,128], index: 2, kind: input, shape index: {}]   ;;  %s124_s3 = inlined_call_operand.hbm [shape: f32[8,128], index: 3, kind: output, shape index: {}]  }
   0x1   :  { %v15_v0 = vld [vmem:[%s121_s0] sm:$0xff]  ;;  %57 = vset.pattern.permute.xlu0 %v86_v1 }
   0x2   :  { %20 = vperm.xlu0 %57, %v15_v0  }
   0x3   :  { %8 = vsyncpa [#allocation3], 0  ;;  %v87_v2 = vmov 1   ;;  %v16_v3 = vld [vmem:[%s122_s1] sm:$0x3]  ;;  %s88_s0 = smov [#allocation2]  }
   0x4   :  { %v23_v5 = vperm.slane %v16_v3, 0  ;;  %v59_v6 = vld [vmem:[%s123_s2] ss:$0 sm:$0xff]  ;;  %v33_v8 = vperm.slane %v16_v3, 1  ;;  %s43_s18 = sshll.u32 %s88_s0, 4  ;;  %s45_s21 = sshll.u32 %s124_s3, 4  ;;  %s44_s18 = int_to_ptr.vmem [resolvable:$true] %s43_s18  ;;  %s46_s21 = int_to_ptr.hbm [resolvable:$true] %s45_s21 }
   0xa   :  { %58 = vset.pattern.permute.xlu0 %v87_v2 }
   0xb   :  { %30 = vperm.xlu0 %58, %v15_v0  }
  0x74   :  { %v21_v4 = vpop.permute.xlu0 %20 }
  0x75   :  { %v24_v7 = vmul.f32 %v23_v5, %v21_v4 }
  0x77   :  { %v28_v10 = vadd.f32 %v59_v6, %v24_v7 }
  0x7d   :  { %v31_v9 = vpop.permute.xlu0 %30 }
  0x7e   :  { %v34_v11 = vmul.f32 %v33_v8, %v31_v9 }
  0x80   :  { %v35_v12 = vadd.f32 %v34_v11, %v28_v10 }
  0x82   :  { %v36_v13 = vmax.f32 %v35_v12, 0.0 }
  0x84   :  { %37 = vst [vmem:[#allocation2] sm:$0xff] %v36_v13 }
  0x85   :  { %48 = dma.vmem_to_hbm [thread:$0]  %s44_s18, 128, %s46_s21, [#allocation3]  }
  0x86   :  { %84 = dma.done.wait [#allocation3], 128  }
  0x87   :  { %85 = vsyncadd [#allocation3], 4294967168 }
  0x88   :  { %53 = vsyncpa [#allocation3], 1 }

</bundles_post_ra>
